<compile_context>
chip_gen: v7x
topology: tpu7x:2x2x1
jax: 0.10.0
libtpu: 0.0.40
codegen_flags: <defaults>
</compile_context>

<pallas_src>
import functools
import math

import jax
import jax.numpy as jnp
from jax.experimental import pallas as pl
from jax.experimental.pallas import tpu as pltpu


# ----------------------------------------------------------------------------
# Pallas kernel
# ----------------------------------------------------------------------------
def _lora_qkv_kernel(tid_ref, did_ref,   # scalar-prefetch (SMEM), used in maps
                     a_ref,              # (1, 1, D, 3r)   stacked [A_q|A_k|A_v]
                     b_ref,              # (1, 1, 3r, 3D)  block-diag(B_q,B_k,B_v)
                     x_ref,              # (1, TL, D)
                     o_ref,              # (1, TL, 3D)
                     *, scaling):
    del tid_ref, did_ref                 # only consumed by the index_maps
    x = x_ref[0]                         # [TL, D]
    a = a_ref[0, 0]                      # [D, 3r]
    b = b_ref[0, 0]                      # [3r, 3D]

    # GEMM1 (fused over heads): u = x @ A_all -> [TL, 3r], fp32 accumulation.
    u = jnp.dot(x, a, preferred_element_type=jnp.float32)
    # Scale the tiny rank-3r intermediate (never the [D, 3D] weight).
    u = (u * scaling).astype(b.dtype)
    # GEMM2 (fused via block-diagonal B_all): o = u @ B_all -> [TL, 3D].
    y = jnp.dot(u, b, preferred_element_type=jnp.float32)
    # Single contiguous lane-dense store of the whole q|k|v output tile.
    o_ref[0] = y.astype(o_ref.dtype)


# ----------------------------------------------------------------------------
# VMEM accounting / tile picking (generation-aware)
# ----------------------------------------------------------------------------
def _vmem_capacity_bytes():
    try:
        return int(pltpu.get_tpu_info().vmem_capacity_bytes)
    except Exception:           # interpret mode / CPU emulation / old runtime
        return 128 << 20


def _gen_budget():
    """(seq-block budget, vmem_limit cap, TL cap) for this chip generation."""
    cap = _vmem_capacity_bytes()
    if cap <= (64 << 20):                     # v7x-class: 64 MiB VMEM per TC
        return 28 << 20, 50 << 20, 512
    return 48 << 20, 100 << 20, 1024          # v5e / v6e: 128 MiB VMEM


def _round_down8(n):
    return max((n // 8) * 8, 8)


def _vmem_need_bytes(tl, D, r, itemsize):
    """Kernel VMEM need: double-buffered blocks + fp32 intermediates (once)."""
    io = 2 * itemsize * tl * 4 * D            # x (D wide) + out (3D wide)
    pools = 2 * itemsize * 12 * r * D         # A_all (3rD) + B_all (9rD)
    interm = 4 * tl * (3 * r + 3 * D)         # fp32 u + fp32 GEMM2 result
    return io + pools + interm


def _pick_seq_block(L, D, r, itemsize, budget_bytes, tl_cap):
    if L <= 8:
        return L                              # block == full dim, always legal
    if L <= tl_cap and _vmem_need_bytes(L, D, r, itemsize) <= budget_bytes:
        return L
    tl = _round_down8(min(L, tl_cap))
    while tl > 8 and _vmem_need_bytes(tl, D, r, itemsize) > budget_bytes:
        tl = _round_down8(tl // 2)
    return tl


# ----------------------------------------------------------------------------
# Wrapper
# ----------------------------------------------------------------------------
def hide_lora_pool_qkv(x, task_ids, depth_ids,
                       q_A, q_B, k_A, k_B, v_A, v_B, scaling,
                       *, seq_block=None):
    """Forward of HideLoraPool with position='qkv'.

    x          : [B, L, D]  (fp32 or bf16; output dtype follows x)
    task_ids   : int, or int32[B]   (train mode uses a single int, e.g. -1)
    depth_ids  : int, or int32[B]
    *_A        : [P, depth, D, r]
    *_B        : [P, depth, r, D]
    returns    : [B, L, 3*D]   (== out['lora_value'] of the torch module)
    """
    B, L, D = x.shape
    P, depth, _, r = q_A.shape
    itemsize = jnp.dtype(x.dtype).itemsize

    # Floor-mod reproduces torch's -1 indexing; NOTE: ids >= P wrap silently.
    task_ids = jnp.broadcast_to(jnp.asarray(task_ids, jnp.int32) % P, (B,))
    depth_ids = jnp.broadcast_to(jnp.asarray(depth_ids, jnp.int32) % depth, (B,))

    # --- one-off pool preparation (tiny tensors, done once per call) --------
    # A_all: [P, depth, D, 3r]  (canonical NN layout -> no in-kernel transpose)
    A_all = jnp.concatenate([q_A, k_A, v_A], axis=-1).astype(x.dtype)
    # B_all: block-diagonal [P, depth, 3r, 3D] so GEMM2 + the q|k|v concat
    # become a single matmul + single full-tile store.
    zpad = jnp.zeros((P, depth, r, D), q_B.dtype)
    B_all = jnp.concatenate([
        jnp.concatenate([q_B, zpad, zpad], axis=-1),
        jnp.concatenate([zpad, k_B, zpad], axis=-1),
        jnp.concatenate([zpad, zpad, v_B], axis=-1),
    ], axis=-2).astype(x.dtype)

    # --- L tiling (generation-aware budget, (8,128)-safe) --------------------
    budget, limit_cap, tl_cap = _gen_budget()
    if L <= 8:
        TL = L
    elif seq_block is None:
        TL = _pick_seq_block(L, D, r, itemsize, budget, tl_cap)
    else:
        TL = max(1, min(int(seq_block), L))
        if TL < L:
            TL = _round_down8(TL)            # keep the (8,128) rule satisfied
    num_l = pl.cdiv(L, TL)

    # --- specs ---------------------------------------------------------------
    # Pool blocks depend only on the batch index -> resident across the L loop.
    if B == 1:
        # Put the L axis first so megacore (v7x) shards the axis that actually
        # has >1 blocks; b is constant so the pools still never re-DMA.
        grid = (num_l, B)
        pool_map = lambda l, b, tid, did: (tid[b], did[b], 0, 0)
        x_map = lambda l, b, tid, did: (b, l, 0)
    else:
        grid = (B, num_l)
        pool_map = lambda b, l, tid, did: (tid[b], did[b], 0, 0)
        x_map = lambda b, l, tid, did: (b, l, 0)

    a_spec = pl.BlockSpec((1, 1, D, 3 * r), pool_map)
    b_spec = pl.BlockSpec((1, 1, 3 * r, 3 * D), pool_map)
    x_spec = pl.BlockSpec((1, TL, D), x_map)
    o_spec = pl.BlockSpec((1, TL, 3 * D), x_map)

    grid_spec = pltpu.PrefetchScalarGridSpec(
        num_scalar_prefetch=2,
        grid=grid,
        in_specs=[a_spec, b_spec, x_spec],
        out_specs=o_spec,
    )

    # --- VMEM limit: actual need (counted once) + headroom, gen-aware cap ----
    need = _vmem_need_bytes(TL, D, r, itemsize)
    vmem_limit = int(min(max(need + (6 << 20), 16 << 20), limit_cap))

    # Memory-bound op: tell XLA so it schedules neighbors sensibly.
    cost = pl.CostEstimate(
        flops=int(24 * B * L * D * r),
        transcendentals=0,
        bytes_accessed=int(itemsize * (B * L * 4 * D + B * 12 * r * D)),
    )

    kernel = functools.partial(_lora_qkv_kernel, scaling=float(scaling))

    return pl.pallas_call(
        kernel,
        out_shape=jax.ShapeDtypeStruct((B, L, 3 * D), x.dtype),
        grid_spec=grid_spec,
        compiler_params=pltpu.CompilerParams(
            dimension_semantics=("parallel", "parallel"),
            vmem_limit_bytes=vmem_limit),
        cost_estimate=cost,
    )(task_ids, depth_ids, A_all, B_all, x)
    # TODO(synk): positions 'out'/'fc1'/'fc2' follow the identical factored
    # pattern (single (x@A)*s@B, no head fusion needed) and are omitted.


# ----------------------------------------------------------------------------
# Pure-JAX reference (mirrors the torch bmm / einsum path, fp32 compute)
# ----------------------------------------------------------------------------
def reference_qkv(x, task_ids, depth_ids, q_A, q_B, k_A, k_B, v_A, v_B, scaling):
    B = x.shape[0]
    P, depth = q_A.shape[0], q_A.shape[1]
    tid = jnp.broadcast_to(jnp.asarray(task_ids, jnp.int32) % P, (B,))
    did = jnp.broadcast_to(jnp.asarray(depth_ids, jnp.int32) % depth, (B,))
    f32 = jnp.float32
    qa, qb = q_A[tid, did].astype(f32), q_B[tid, did].astype(f32)
    ka, kb = k_A[tid, did].astype(f32), k_B[tid, did].astype(f32)
    va, vb = v_A[tid, did].astype(f32), v_B[tid, did].astype(f32)
    wq = jnp.einsum('bdr,brz->bdz', qa, qb)
    wk = jnp.einsum('bdr,brz->bdz', ka, kb)
    wv = jnp.einsum('bdr,brz->bdz', va, vb)
    w = jnp.concatenate([wq, wk, wv], axis=-1) * scaling
    return jnp.einsum('bld,bdz->blz', x.astype(f32), w)


# ----------------------------------------------------------------------------
# Tests
# ----------------------------------------------------------------------------
def _make_inputs(key, pool_size, depth, dim, rank, batch, seq, dtype):
    keys = jax.random.split(key, 8)
    bound = 1.0 / math.sqrt(rank)
    A_shape = (pool_size, depth, dim, rank)
    B_shape = (pool_size, depth, rank, dim)
    # The torch module zero-inits *_B (forward would be trivially zero); use a
    # small random B so the numerics are actually exercised.
    q_A = jax.random.uniform(keys[0], A_shape, jnp.float32, -bound, bound)
    k_A = jax.random.uniform(keys[1], A_shape, jnp.float32, -bound, bound)
    v_A = jax.random.uniform(keys[2], A_shape, jnp.float32, -bound, bound)
    q_B = 0.02 * jax.random.normal(keys[3], B_shape, jnp.float32)
    k_B = 0.02 * jax.random.normal(keys[4], B_shape, jnp.float32)
    v_B = 0.02 * jax.random.normal(keys[5], B_shape, jnp.float32)
    x = jax.random.normal(keys[6], (batch, seq, dim), jnp.float32)
    pools = tuple(p.astype(dtype) for p in (q_A, q_B, k_A, k_B, v_A, v_B))
    return x.astype(dtype), pools, keys[7]


def _run_case(key, pool_size, depth, dim, rank, batch, seq, scaling,
              dtype=jnp.float32, seq_block=None, atol=2e-5, rtol=1e-4):
    x, (q_A, q_B, k_A, k_B, v_A, v_B), idkey = _make_inputs(
        key, pool_size, depth, dim, rank, batch, seq, dtype)

    # --- train-style call: single task_id / depth_id (torch defaults -1) -----
    out_train = hide_lora_pool_qkv(x, -1, -1, q_A, q_B, k_A, k_B, v_A, v_B,
                                   scaling, seq_block=seq_block)
    out_train = jax.block_until_ready(out_train)
    ref_train = reference_qkv(x, -1, -1, q_A, q_B, k_A, k_B, v_A, v_B, scaling)

    # --- eval-style call: per-sample task ids (torch.bmm path) ---------------
    tids = jax.random.randint(idkey, (batch,), 0, pool_size, jnp.int32)
    dids = (tids + 1) % depth
    out_eval = hide_lora_pool_qkv(x, tids, dids, q_A, q_B, k_A, k_B, v_A, v_B,
                                  scaling, seq_block=seq_block)
    out_eval = jax.block_until_ready(out_eval)
    ref_eval = reference_qkv(x, tids, dids, q_A, q_B, k_A, k_B, v_A, v_B,
                             scaling)

    assert out_train.shape == (batch, seq, 3 * dim)
    assert out_train.dtype == x.dtype
    ot, oe = out_train.astype(jnp.float32), out_eval.astype(jnp.float32)
    assert jnp.allclose(ot, ref_train, atol=atol, rtol=rtol), \
        float(jnp.max(jnp.abs(ot - ref_train)))
    assert jnp.allclose(oe, ref_eval, atol=atol, rtol=rtol), \
        float(jnp.max(jnp.abs(oe - ref_eval)))


if __name__ == "__main__":
    lora_alpha = 1

    # Small config consistent with the module's __init__ (fp32).
    rank = 4
    _run_case(jax.random.PRNGKey(0),
              pool_size=3, depth=2, dim=32, rank=rank,
              batch=2, seq=8, scaling=lora_alpha / rank)

    # Lane-aligned config (D multiple of 128) exercising the fused GEMMs, the
    # single full-width output store, and the L-tiled grid (seq_block=8).
    rank = 8
    _run_case(jax.random.PRNGKey(1),
              pool_size=3, depth=2, dim=128, rank=rank,
              batch=2, seq=16, scaling=lora_alpha / rank, seq_block=8)

    # bf16 I/O path (halved HBM traffic) + B==1 grid reordering for megacore.
    rank = 8
    _run_case(jax.random.PRNGKey(2),
              pool_size=3, depth=2, dim=128, rank=rank,
              batch=1, seq=32, scaling=lora_alpha / rank,
              dtype=jnp.bfloat16, seq_block=8, atol=1e-3, rtol=3e-2)

    print("KERNEL_OK")
</pallas_src>

<mosaic_0001>
module attributes {stable_mosaic.version = 11 : i64} {
  func.func @_lora_qkv_kernel(%arg0: i32, %arg1: i32, %arg2: memref<2xi32, #tpu.memory_space<smem>>, %arg3: memref<2xi32, #tpu.memory_space<smem>>, %arg4: memref<1x1x32x12xf32, #tpu.memory_space<vmem>>, %arg5: memref<1x1x12x96xf32, #tpu.memory_space<vmem>>, %arg6: memref<1x8x32xf32, #tpu.memory_space<vmem>>, %arg7: memref<1x8x96xf32, #tpu.memory_space<vmem>>) attributes {dimension_semantics = [#tpu.dimension_semantics<parallel>, #tpu.dimension_semantics<parallel>], iteration_bounds = array<i64: 2, 1>, scalar_prefetch = 2 : i64, scratch_operands = 0 : i64, tpu.core_type = #tpu.core_type<tc>, window_params = [{transform_indices = @transform_0, window_bounds = array<i64: 1, 1, 32, 12>}, {transform_indices = @transform_1, window_bounds = array<i64: 1, 1, 12, 96>}, {transform_indices = @transform_2, window_bounds = array<i64: 1, 8, 32>}, {transform_indices = @transform_3, window_bounds = array<i64: 1, 8, 96>}]} {
    %c0 = arith.constant 0 : index
    %c0_0 = arith.constant 0 : index
    %c0_1 = arith.constant 0 : index
    %0 = vector.load %arg6[%c0, %c0_0, %c0_1] : memref<1x8x32xf32, #tpu.memory_space<vmem>>, vector<1x8x32xf32>
    %1 = vector.shape_cast %0 : vector<1x8x32xf32> to vector<8x32xf32>
    %c0_2 = arith.constant 0 : index
    %c0_3 = arith.constant 0 : index
    %c0_4 = arith.constant 0 : index
    %c0_5 = arith.constant 0 : index
    %2 = vector.load %arg4[%c0_2, %c0_3, %c0_4, %c0_5] : memref<1x1x32x12xf32, #tpu.memory_space<vmem>>, vector<1x1x32x12xf32>
    %3 = vector.shape_cast %2 : vector<1x1x32x12xf32> to vector<32x12xf32>
    %c0_6 = arith.constant 0 : index
    %c0_7 = arith.constant 0 : index
    %c0_8 = arith.constant 0 : index
    %c0_9 = arith.constant 0 : index
    %4 = vector.load %arg5[%c0_6, %c0_7, %c0_8, %c0_9] : memref<1x1x12x96xf32, #tpu.memory_space<vmem>>, vector<1x1x12x96xf32>
    %5 = vector.shape_cast %4 : vector<1x1x12x96xf32> to vector<12x96xf32>
    %cst = arith.constant dense<0.000000e+00> : vector<8x12xf32>
    %6 = tpu.matmul %1, %3, %cst {dimension_numbers = #tpu.dot_dimension_numbers<[1], [0], [0], [1], [0, 0, 1, 1], [], []>} : vector<8x32xf32>, vector<32x12xf32>, vector<8x12xf32> -> vector<8x12xf32>
    %cst_10 = arith.constant 2.500000e-01 : f32
    %7 = vector.broadcast %cst_10 : f32 to vector<8x12xf32>
    %8 = arith.mulf %6, %7 : vector<8x12xf32>
    %cst_11 = arith.constant dense<0.000000e+00> : vector<8x96xf32>
    %9 = tpu.matmul %8, %5, %cst_11 {dimension_numbers = #tpu.dot_dimension_numbers<[1], [0], [0], [1], [0, 0, 1, 1], [], []>} : vector<8x12xf32>, vector<12x96xf32>, vector<8x96xf32> -> vector<8x96xf32>
    %c0_12 = arith.constant 0 : index
    %c0_13 = arith.constant 0 : index
    %c0_14 = arith.constant 0 : index
    %10 = vector.load %arg7[%c0_12, %c0_13, %c0_14] : memref<1x8x96xf32, #tpu.memory_space<vmem>>, vector<1x8x96xf32>
    %11 = vector.shape_cast %10 : vector<1x8x96xf32> to vector<8x96xf32>
    %12 = vector.shape_cast %9 : vector<8x96xf32> to vector<1x8x96xf32>
    tpu.vector_store %arg7[%c0_12, %c0_13, %c0_14], %12 {strides = array<i32>} : memref<1x8x96xf32, #tpu.memory_space<vmem>>, vector<1x8x96xf32>,
    return
  }
  func.func @transform_0(%arg0: i32, %arg1: i32, %arg2: memref<2xi32, #tpu.memory_space<smem>>, %arg3: memref<2xi32, #tpu.memory_space<smem>>) -> (i32, i32, i32, i32) {
    %0 = arith.index_cast %arg0 : i32 to index
    %1 = memref.load %arg2[%0] : memref<2xi32, #tpu.memory_space<smem>>
    %2 = arith.index_cast %arg0 : i32 to index
    %3 = memref.load %arg3[%2] : memref<2xi32, #tpu.memory_space<smem>>
    %c0_i32 = arith.constant 0 : i32
    %c0_i32_0 = arith.constant 0 : i32
    %c0_i32_1 = arith.constant 0 : i32
    return %1, %3, %c0_i32, %c0_i32_0 : i32, i32, i32, i32
  }
  func.func @transform_1(%arg0: i32, %arg1: i32, %arg2: memref<2xi32, #tpu.memory_space<smem>>, %arg3: memref<2xi32, #tpu.memory_space<smem>>) -> (i32, i32, i32, i32) {
    %0 = arith.index_cast %arg0 : i32 to index
    %1 = memref.load %arg2[%0] : memref<2xi32, #tpu.memory_space<smem>>
    %2 = arith.index_cast %arg0 : i32 to index
    %3 = memref.load %arg3[%2] : memref<2xi32, #tpu.memory_space<smem>>
    %c0_i32 = arith.constant 0 : i32
    %c0_i32_0 = arith.constant 0 : i32
    %c0_i32_1 = arith.constant 0 : i32
    return %1, %3, %c0_i32, %c0_i32_0 : i32, i32, i32, i32
  }
  func.func @transform_2(%arg0: i32, %arg1: i32, %arg2: memref<2xi32, #tpu.memory_space<smem>>, %arg3: memref<2xi32, #tpu.memory_space<smem>>) -> (i32, i32, i32) {
    %c0_i32 = arith.constant 0 : i32
    %c0_i32_0 = arith.constant 0 : i32
    return %arg0, %arg1, %c0_i32 : i32, i32, i32
  }
  func.func @transform_3(%arg0: i32, %arg1: i32, %arg2: memref<2xi32, #tpu.memory_space<smem>>, %arg3: memref<2xi32, #tpu.memory_space<smem>>) -> (i32, i32, i32) {
    %c0_i32 = arith.constant 0 : i32
    %c0_i32_0 = arith.constant 0 : i32
    return %arg0, %arg1, %c0_i32 : i32, i32, i32
  }
}

</mosaic_0001>

<bundles_post_ra>
// kernel: tpu_custom_call.1
= control target key start
LH: loop header
LB: loop body
LE: loop exit
PB: predicated region body
PF: predicated region fallthrough
CT: control target
= control target key end

     0   :  { %s977_s0 = inlined_call_operand.vmem [shape: s32[2], index: 0, kind: input, shape index: {}]   ;;  %s978_s2 = inlined_call_operand.vmem [shape: f32[3,2,32,12], index: 2, kind: input, shape index: {}]   ;;  %s979_s3 = inlined_call_operand.vmem [shape: f32[3,2,12,96], index: 3, kind: input, shape index: {}]   ;;  %s980_s4 = inlined_call_operand.vmem [shape: f32[2,8,32], index: 4, kind: input, shape index: {}]   ;;  %s981_s5 = inlined_call_operand.hbm [shape: f32[2,8,96], index: 5, kind: output, shape index: {}]   ;;  %s982_s1 = inlined_call_operand.vmem [shape: s32[2], index: 1, kind: input, shape index: {}]  }
   0x1   :  { %s10_s20 = sshll.u32 %s977_s0, 4  ;;  %s14_s23 = sshll.u32 %s982_s1, 4  ;;  %s11_s20 = int_to_ptr.vmem [resolvable:$true] %s10_s20  ;;  %s15_s23 = int_to_ptr.vmem [resolvable:$true] %s14_s23 }
   0x2   :  { %s706_s24 = scalar_lea.vmem %s11_s20, 16  ;;  %p711_p1 = scmp.lt.s32.totalorder %s11_s20, %s11_s20 }
   0x3   :  { %p707_p0 = scmp.ne.s32.totalorder %s11_s20, %s706_s24  ;;  %p712_p2 = scmp.lt.s32.totalorder %s706_s24, %s706_s24 }
   0x5   :  { %p713_p3 = por %p712_p2, %p711_p1 }
   0x7   :  { %p714_p4 = pnand %p713_p3, %p707_p0 }
   0x9   :  { %717 = shalt.err (!%p714_p4)  }
   0xa   :  { %s812_s25 = smov [#allocation3]   ;;  %s718_s26 = scalar_lea.vmem %s15_s23, 16 }
   0xb   :  { %13 = dma.vmem_to_smem %s11_s20, 16, %s812_s25, [#allocation2] }
   0xc   :  { %p719_p5 = scmp.ne.s32.totalorder %s15_s23, %s718_s26  ;;  %p723_p6 = scmp.lt.s32.totalorder %s15_s23, %s15_s23 }
   0xd   :  { %p724_p7 = scmp.lt.s32.totalorder %s718_s26, %s718_s26 }
   0xf   :  { %p725_p8 = por %p724_p7, %p723_p6 }
  0x11   :  { %p726_p9 = pnand %p725_p8, %p719_p5 }
  0x13   :  { %729 = shalt.err (!%p726_p9)  }
  0x14   :  { %s813_s0 = smov [#allocation4]  }
  0x15   :  { %17 = dma.vmem_to_smem %s15_s23, 16, %s813_s0, [#allocation2] }
  0x16   :  { %782 = dma.done.wait [#allocation2], 32 }
  0x17   :  { %783 = vsyncadd [#allocation2], 4294967264 }
  0x18   :  { %19 = sfence }
  0x19   :  { %20 = vsyncpa [#allocation6], 0 }
  0x1a   :  { %22 = vsyncpa [#allocation6 + $0x1], 0  ;;  %s855_s1 = smov 0   ;;  %s857_s27 = smov 0  }
  0x1b   :  { %s859_s28 = smov 0   ;;  %s861_s29 = smov 0  }
  0x1c   :  { %s863_s30 = smov 0   ;;  %s865_s6 = smov 0  }
  0x1d LB: > { %s589_s7 = sadd.s32 4294967295, %s810_s6   ;;  %s590_s8 = sadd.s32 4294967294, %s810_s6   ;;  %s810_s6 = sphi %s865_s6, %s28_s6   ;;  %s806_s30 = sphi %s863_s30, %s989_s30   ;;  %s802_s29 = sphi %s861_s29, %s988_s29   ;;  %s798_s28 = sphi %s859_s28, %s987_s28   ;;  %s794_s27 = sphi %s857_s27, %s986_s27   ;;  %s790_s1 = sphi %s855_s1, %s985_s1  }
  0x1e   : > { %s40_s9 = sadd.s32 1, %s806_s30  ;;  %s141_s10 = sadd.s32 1, %s798_s28 }
  0x1f   : > { %p42_p10 = scmp.ge.s32.totalorder %s40_s9, 2  ;;  %p151_p11 = scmp.ne.s32.totalorder %s798_s28, %s794_s27 }
  0x20   : > { %p152_p12 = scmp.eq.s32.totalorder %s589_s7, 1  ;;  %p157_p13 = scmp.ne.s32.totalorder %s794_s27, %s790_s1 }
  0x21   : > { %s991_s9 = smov (%p42_p10, %s40_s9), 0  ;;  %p158_p1 = scmp.eq.s32.totalorder %s590_s8, 1 }
  0x22   : > { %p895_p0 = por %p152_p12, %p151_p11  ;;  %s136_s12 = ssub.s32 %s806_s30, %s991_s9 }
  0x23   : > { %p593_p2 = scmp.ge.s32.totalorder %s810_s6, 1  ;;  %p139_p3 = scmp.eq.s32.totalorder %s136_s12, 0 }
  0x24   : > { %p902_p4 = por %p158_p1, %p157_p13  ;;  %p218_p5 = scmp.lt.s32.totalorder %s810_s6, 3 }
  0x25   : > { %s908_s14 = scalar_select %p139_p3, %s798_s28, %s141_s10  }
  0x26   : > { %p219_p6 = pnand %p593_p2, %p218_p5 }
  0x27   : > { %s266_s15 = sld [smem:[#allocation3 + %s802_s29]] (!%p219_p6)  ;;  %v814_v0 = vmov (!%p219_p6), 0.0|0.0   ;;  %vm815_vm0 = vmmov (!%p219_p6), 0   ;;  %v816_v1 = vmov (!%p219_p6), 0.0   ;;  %p292_p7 = scmp.lt.s32.totalorder (!%p219_p6), %s802_s29, 1  ;;  %vm306_vm1 = vcmask (!%p219_p6), 261120  }
  0x28   : > { %222 = sbr.rel (%p219_p6) target bundleno = 503 (0x1f7), region = 32  ;;  %s267_s16 = sld [smem:[#allocation4 + %s802_s29]] (!%p219_p6)  ;;  %635 = vmatprep.subr.bf16.mxu0 (!%p219_p6), %v814_v0  ;;  %625 = vmatprep.mubr.msk.f32.mxu0 (!%p219_p6), %vm815_vm0, %v816_v1  ;;  %vm385_vm2 = vcmask (!%p219_p6), 1043456   ;;  %vm817_vm3 = vmmov (!%p219_p6), 1   ;;  %vm381_vm5 = vcmask (!%p219_p6), 97280   ;;  %vm459_vm6 = vcmask (!%p219_p6), 785408  }
  0x29   : > { %641 = vmatprep.subr.bf16.mxu1 (!%p219_p6), %v814_v0  ;;  %632 = vmatprep.mubr.msk.f32.mxu1 (!%p219_p6), %vm815_vm0, %v816_v1  ;;  %s279_s8 = sld [smem:[#allocation3 + %s802_s29]] (!%p219_p6)  ;;  %vm643_vm4 = vmpackc.low (!%p219_p6), %vm385_vm2, %vm817_vm3  ;;  %s606_s23 = sshll.u32 (!%p219_p6), %s802_s29, 7 }
  0x2a   : > { %s280_s10 = sld [smem:[#allocation4 + %s802_s29]] (!%p219_p6) }
  0x2d   : > { %p268_p8 = scmp.lt.s32.totalorder (!%p219_p6), %s266_s15, 2 }
  0x2e   : > { %p270_p9 = scmp.lt.s32.totalorder (!%p219_p6), %s267_s16, 1 }
  0x2f   : > { %s293_s17 = scalar_select %p292_p7, %s802_s29, 1 }
  0x30   : > { %s993_s15 = smov (!%p268_p8, %s266_s15), 2  ;;  %s995_s16 = smov (!%p270_p9, %s267_s16), 1 }
  0x31   : > { %s596_s18 = sshll.u32 %s993_s15, 3  ;;  %s595_s19 = sshll.u32 %s995_s16, 2 }
  0x32   : > { %s274_s20 = sadd.s32 %s596_s18, %s595_s19  ;;  %s601_s25 = sshll.u32 %s293_s17, 3 }
  0x33   : > { %s597_s21 = sshll.u32 %s274_s20, 3  ;;  %s298_s7 = scalar_lea.vmem %s980_s4, %s601_s25 }
  0x34   : > { %s276_s24 = scalar_lea.vmem %s978_s2, %s597_s21  ;;  %v299_v8 = vld [vmem:[%s298_s7] sm:$0xff]  ;;  %p281_p10 = scmp.lt.s32.totalorder %s279_s8, 2 }
  0x35   : > { %v300_v2 = vld [vmem:[%s276_s24] sm:$0xff]  ;;  %v301_v3 = vld [vmem:[%s276_s24 + $0x8] sm:$0xff]  ;;  %v302_v4 = vld [vmem:[%s276_s24 + $0x10] sm:$0xff]  ;;  %p283_p11 = scmp.lt.s32.totalorder %s280_s10, 1  ;;  %s263_s21 = sand.u32 1, %s794_s27  }
  0x36   : > { %v636_v5 = vpack.c.bf16 %v301_v3, %v300_v2  ;;  %v303_v6 = vld [vmem:[%s276_s24 + $0x18] sm:$0xff]  ;;  %s997_s8 = smov (!%p281_p10, %s279_s8), 2  ;;  %s594_s22 = sshll.u32 %s263_s21, 3 }
  0x37   : > { %v639_v7 = vpack.c.bf16 %v303_v6, %v302_v4  ;;  %s999_s10 = smov (!%p283_p11, %s280_s10), 1  ;;  %s599_s12 = sshll.u32 %s997_s8, 2 }
  0x38   : > { %637 = vmatpush3.bf16.msra.mxu0 %v636_v5  ;;  %s598_s15 = sshll.u32 %s999_s10, 1  ;;  %s265_s24 = scalar_lea.vmem [#allocation5], %s594_s22 }
  0x39   : > { %638 = vmatprep.subr.bf16.mxu0 %v814_v0  ;;  %s287_s16 = sadd.s32 %s599_s12, %s598_s15  ;;  %s476_s25 = sshll.u32 %s265_s24, 4  ;;  %s932_s25 = int_to_ptr.vmem [resolvable:$true] %s476_s25 }
  0x3a   : > { %s600_s17 = sshll.u32 %s287_s16, 3  ;;  %s930_s7 = scalar_lea.hbm %s981_s5, %s606_s23 }
  0x3b   : > { %s289_s20 = scalar_lea.vmem %s979_s3, %s600_s17  ;;  %s462_s8 = scalar_lea.sflag [#allocation6], %s263_s21 }
  0x3c   : > { %640 = vmatpush3.bf16.msra.mxu0 %v639_v7  ;;  %v304_v9 = vld [vmem:[%s289_s20] sm:$0xff]  ;;  %v305_v10 = vld [vmem:[%s289_s20 + $0x8] sm:$0xf]  ;;  %s730_s10 = scalar_lea.vmem %s932_s25, 128  ;;  %s818_s29 = smov [#allocation5]  }
  0x3d   : > { %v642_v11 = vpack.c.bf16 %v305_v10, %v304_v9  ;;  %p731_p12 = scmp.ne.s32.totalorder %s932_s25, %s730_s10  ;;  %s734_s12 = sshll.u32 %s818_s29, 4  ;;  %s735_s12 = int_to_ptr.vmem [resolvable:$false] %s734_s12 }
  0x3e   : > { %s736_s15 = scalar_lea.vmem %s735_s12, 256  ;;  %p737_p2 = scmp.lt.s32.totalorder %s932_s25, %s735_s12 }
  0x3f   : > { %626 = vmatmul.mubr.msk.f32.vlgmr.msra.gmra.mrb[0].mxu0 %vm306_vm1, %v299_v8  ;;  %644 = vmatpush3.bf16.msk.msra.mxu1 %vm643_vm4, %v642_v11  ;;  %p732_p13 = pnand %p731_p12, %p895_p0  ;;  %p738_p3 = scmp.lt.s32.totalorder %s736_s15, %s730_s10 }
  0x41   : > { %p733_p1 = pneg %p732_p13  ;;  %p739_p5 = por %p738_p3, %p737_p2 }
  0x43   : > { %p740_p6 = pnand %p739_p5, %p733_p1 }
 0x112   : > { %v376_v12 = vpop.f32.mrb[0].mxu0 }
 0x113   : > { %v380_v13 = vmul.f32 0.25, %v376_v12  ;;  %v627_v14 = vpop.f32.mrb[1].mxu0 }
 0x115   : > { %633 = vmatmul.mubr.msk.f32.vlgmr.msra.gmra.mrb[0].mxu1 %vm381_vm5, %v380_v13 }
 0x1e8   : > { %v455_v15 = vpop.f32.mrb[0].mxu1 }
 0x1e9   : > { %460 = vst.msk [vmem:[%s265_s24] sm:$0xff] %vm459_vm6, %v455_v15  ;;  %v634_v16 = vpop.f32.mrb[1].mxu1 }
 0x1ea   : > { %743 = shalt.err (!%p740_p6)
}
 0x1eb   : > { %s744_s16 = scalar_lea.hbm %s930_s7, 128  ;;  %s748_s19 = scalar_lea.hbm %s981_s5, 256 }
 0x1ec   : > { %p745_p7 = scmp.ne.s32.totalorder %s930_s7, %s744_s16  ;;  %p749_p10 = scmp.lt.u32.totalorder %s930_s7, %s981_s5 }
 0x1ed   : > { %p750_p11 = scmp.lt.u32.totalorder %s748_s19, %s744_s16  ;;  %p752_p13 = scmp.lt.u32.totalorder %s744_s16, %s930_s7 }
 0x1ee   : > { %p746_p8 = pnand %p745_p7, %p895_p0 }
 0x1ef   : > { %p751_p12 = por %p750_p11, %p749_p10 }
 0x1f0   : > { %p747_p9 = pneg %p746_p8 }
 0x1f1   : > { %p753_p1 = por %p752_p13, %p751_p12 }
 0x1f3   : > { %p754_p2 = pnand %p753_p1, %p747_p9 }
 0x1f5   : > { %757 = shalt.err (!%p754_p2)
}
 0x1f6   : > { %645 = dma.vmem_to_hbm [thread:$0]  (%p895_p0), %s932_s25, 128, %s930_s7, %s462_s8  }
 0x1f7 PF: > { %p651_p3 = scmp.ge.s32.totalorder %s810_s6, 2  ;;  %s488_s22 = sand.u32 1, %s790_s1  }
 0x1f8   : > { %s489_s23 = scalar_lea.sflag [#allocation6], %s488_s22 }
 0x1f9   : > { %p648_p5 = pnand %p651_p3, %p902_p4 }
 0x1fb   : > { %785 = dma.done.wait (!%p648_p5), %s489_s23, 128  }
 0x1fc   : > { %787 = vsyncadd (!%p648_p5), %s489_s23, 4294967168  ;;  %s28_s6 = sadd.s32 1, %s810_s6   ;;  %s985_s1 = smov %s794_s27 }
 0x1fd   : > { %p25_p6 = scmp.ge.s32.totalorder %s28_s6, 4   ;;  %s986_s27 = smov %s798_s28 }
 0x1fe   : > { %s987_s28 = smov %s908_s14  ;;  %s988_s29 = smov %s806_s30 }
 0x1ff   : > { %s989_s30 = smov %s991_s9  ;;  %27 = sbr.rel (!%p25_p6) target bundleno = 29 (0x1d), region = 73 }
 0x206   :  { %494 = vsyncpa [#allocation6], 1 }
 0x207   :  { %496 = vsyncpa [#allocation6 + $0x1], 1 }

</bundles_post_ra>
